<compile_context>
chip_gen: v7x
topology: tpu7x:2x2x1
jax: 0.10.0
libtpu: 0.0.40
codegen_flags: <defaults>
</compile_context>

<pallas_src>
import jax
import jax.numpy as jnp
from jax import lax
from jax.experimental import pallas as pl
from jax.experimental.pallas import tpu as pltpu


PAD_COLS = 128  # lane-dense fused-head width: [marks | log-intensity | zero pad]


def _round_up(v, m):
    return ((v + m - 1) // m) * m


def _cdiv(a, b):
    return -(-a // b)


def _choose_tiling(n_rows, tile_n_max):
    """Row tiling: multiples of 16 (bf16 sublane packing); prefer an even
    grid with >= 2 steps so both v7x TensorCores participate."""
    min_tile = 16
    tile_n = min(tile_n_max, _round_up(n_rows, min_tile))
    n_tiles = _cdiv(n_rows, tile_n)
    if n_tiles == 1 and n_rows >= 2 * min_tile:
        n_tiles = 2
    elif n_tiles > 1 and n_tiles % 2 == 1:
        n_tiles += 1
    tile_n = _round_up(_cdiv(n_rows, n_tiles), min_tile)
    n_pad = _round_up(n_rows, tile_n)
    n_tiles = n_pad // tile_n
    return tile_n, n_pad, n_tiles


def _make_kernel(num_channels):
    C = num_channels

    def kernel(x_ref, w1_ref, b1_ref, w2_ref, b2_ref, wh_ref, bh_ref, out_ref):
        # ---- preprocessing layer 1: Linear + ReLU (Dropout = identity, eval) ----
        # TODO(synk): training-mode Dropout would use pltpu.prng_* masks; eval here.
        h = jnp.dot(x_ref[...], w1_ref[...], preferred_element_type=jnp.float32)
        h = jnp.maximum(h + b1_ref[...], 0.0)

        # ---- preprocessing layer 2: Linear + ReLU ----
        h = jnp.dot(h.astype(w2_ref.dtype), w2_ref[...],
                    preferred_element_type=jnp.float32)
        h = jnp.maximum(h + b2_ref[...], 0.0)

        # ---- fused head: [mark_net | intensity_net | zero-pad] in one MXU pass ----
        head = jnp.dot(h.astype(wh_ref.dtype), wh_ref[...],
                       preferred_element_type=jnp.float32) + bh_ref[...]

        col = lax.broadcasted_iota(jnp.int32, head.shape, 1)
        mark_mask = col < C

        # log_softmax over the first C (mark) columns only
        masked = jnp.where(mark_mask, head, -jnp.inf)
        m = jnp.max(masked, axis=-1, keepdims=True)
        lse = jnp.log(jnp.sum(jnp.exp(masked - m), axis=-1, keepdims=True)) + m

        # log_intensity lives in column C of the fused head
        log_intensity = jnp.sum(jnp.where(col == C, head, 0.0),
                                axis=-1, keepdims=True)

        # single lane-dense (TILE_N, 128) store:
        #   cols [0, C)   -> log_mark_probs + log_intensity
        #   col  C        -> exp(log_intensity)  (== total_intensity)
        #   cols (C, 128) -> 0
        shift = log_intensity - lse                       # one fused broadcast add
        out = jnp.where(mark_mask, head + shift,
                        jnp.where(col == C, jnp.exp(log_intensity), 0.0))
        out_ref[...] = out.astype(out_ref.dtype)

    return kernel


def pack_params(params):
    """Zero-pad hidden dim to a multiple of 128 and fuse the mark/intensity heads.

    Numerics preserved: padded input rows/cols of the weights are zero and the
    padded hidden lanes are ReLU(0 + 0) = 0, so they contribute nothing.
    """
    F_in, H = params["w1"].shape
    C = params["wm"].shape[1]
    assert C + 1 <= PAD_COLS
    H_pad = _round_up(H, 128)

    def padded(w, rows, cols):
        out = jnp.zeros((rows, cols), jnp.float32)
        return out.at[:w.shape[0], :w.shape[1]].set(w)

    w1 = padded(params["w1"], F_in, H_pad)
    b1 = padded(params["b1"], 1, H_pad)
    w2 = padded(params["w2"], H_pad, H_pad)
    b2 = padded(params["b2"], 1, H_pad)
    w_head = padded(params["wm"], H_pad, PAD_COLS).at[:H, C:C + 1].set(params["wi"])
    b_head = padded(params["bm"], 1, PAD_COLS).at[:, C:C + 1].set(params["bi"])

    return {
        "w1": w1.astype(jnp.bfloat16),
        "b1": b1,
        "w2": w2.astype(jnp.bfloat16),
        "b2": b2,
        "w_head": w_head.astype(jnp.bfloat16),
        "b_head": b_head,
        "num_channels": C,
        "hidden_pad": H_pad,
        "input_size": F_in,
    }


def intensity_net_forward(args, packed, *, tile_n_max=2048, out_dtype=jnp.float32):
    """args: list of (B, S, f_i) arrays.  Trace this inside the caller's jit so
    the concat/cast and the final slab slices fuse with neighbouring ops."""
    B, S = args[0].shape[:2]
    N = B * S
    F_in = packed["input_size"]
    H_pad = packed["hidden_pad"]
    C = packed["num_channels"]

    # concat + f32->bf16 cast fuse into a single HBM pass under jit
    x = jnp.concatenate([a.reshape(N, -1) for a in args], axis=-1)
    assert x.shape[-1] == F_in
    x = x.astype(jnp.bfloat16)

    tile_n, n_pad, n_tiles = _choose_tiling(N, tile_n_max)
    if n_pad != N:
        x = jnp.pad(x, ((0, n_pad - N), (0, 0)))

    if n_tiles >= 3:
        # deeper buffering hides input DMA behind the tiny per-tile compute
        x_spec = pl.BlockSpec((tile_n, F_in), lambda r: (r, 0),
                              pipeline_mode=pl.Buffered(3))
    else:
        x_spec = pl.BlockSpec((tile_n, F_in), lambda r: (r, 0))

    # weights/biases stay VMEM-resident across the whole grid (constant index map)
    const = lambda shape: pl.BlockSpec(shape, lambda r: (0, 0))

    out_bytes = jnp.dtype(out_dtype).itemsize
    cost = pl.CostEstimate(
        flops=2 * n_pad * (F_in * H_pad + H_pad * H_pad + H_pad * PAD_COLS),
        transcendentals=n_pad * (PAD_COLS + 2),           # exp over full 128 lanes
        bytes_accessed=(2 * n_pad * F_in                              # bf16 inputs
                        + out_bytes * n_pad * PAD_COLS                # output slab
                        + 2 * (F_in * H_pad + H_pad * H_pad + H_pad * PAD_COLS)),
    )

    slab = pl.pallas_call(
        _make_kernel(C),
        out_shape=jax.ShapeDtypeStruct((n_pad, PAD_COLS), out_dtype),
        grid=(n_tiles,),
        in_specs=[
            x_spec,
            const((F_in, H_pad)),        # w1
            const((1, H_pad)),           # b1
            const((H_pad, H_pad)),       # w2
            const((1, H_pad)),           # b2
            const((H_pad, PAD_COLS)),    # fused head weight  [wm | wi | 0]
            const((1, PAD_COLS)),        # fused head bias    [bm | bi | 0]
        ],
        out_specs=pl.BlockSpec((tile_n, PAD_COLS), lambda r: (r, 0)),
        compiler_params=pltpu.CompilerParams(
            dimension_semantics=("parallel",),
            vmem_limit_bytes=32 * 1024 * 1024),
        cost_estimate=cost,
    )(x, packed["w1"], packed["b1"], packed["w2"], packed["b2"],
      packed["w_head"], packed["b_head"])

    # Lazy slices of the lane-dense slab: when this function is traced inside a
    # larger jit these fuse into the consumers instead of re-reading the slab.
    all_log_mark_intensities = slab[:N, :C].reshape(B, S, C).astype(jnp.float32)
    total_intensity = slab[:N, C].reshape(B, S).astype(jnp.float32)
    return {
        "all_log_mark_intensities": all_log_mark_intensities,
        "total_intensity": total_intensity,     # exp(log_intensity).squeeze(-1)
        "zero_probs": None,                     # zero_inflated=False
    }


def init_params(key, input_size, hidden_size, num_channels):
    """Deterministic synthetic parameters (PyTorch-like uniform(-1/sqrt(fan_in), ..))."""
    ks = jax.random.split(key, 8)

    def lin(kw, kb, fan_in, fan_out):
        bound = 1.0 / jnp.sqrt(jnp.float32(fan_in))
        w = jax.random.uniform(kw, (fan_in, fan_out), jnp.float32, -bound, bound)
        b = jax.random.uniform(kb, (1, fan_out), jnp.float32, -bound, bound)
        return w, b

    w1, b1 = lin(ks[0], ks[1], input_size, hidden_size)
    w2, b2 = lin(ks[2], ks[3], hidden_size, hidden_size)
    wm, bm = lin(ks[4], ks[5], hidden_size, num_channels)
    wi, bi = lin(ks[6], ks[7], hidden_size, 1)
    return {"w1": w1, "b1": b1, "w2": w2, "b2": b2,
            "wm": wm, "bm": bm, "wi": wi, "bi": bi}


if __name__ == "__main__":
    key = jax.random.PRNGKey(0)
    k_h, k_t, k_p = jax.random.split(key, 3)

    # small shapes consistent with the module:
    B, S = 2, 8
    hidden_state_dim, time_feat_dim = 24, 8     # concatenated -> input_size = 32
    input_size = hidden_state_dim + time_feat_dim
    hidden_size = 32
    num_channels = 16

    hidden_states = jax.random.normal(k_h, (B, S, hidden_state_dim), jnp.float32)
    time_feats = jax.random.normal(k_t, (B, S, time_feat_dim), jnp.float32)

    params = init_params(k_p, input_size, hidden_size, num_channels)
    packed = pack_params(params)

    fwd = jax.jit(lambda hs, tf: intensity_net_forward([hs, tf], packed))
    out = fwd(hidden_states, time_feats)
    jax.block_until_ready(out["all_log_mark_intensities"])
    jax.block_until_ready(out["total_intensity"])

    assert out["all_log_mark_intensities"].shape == (B, S, num_channels)
    assert out["total_intensity"].shape == (B, S)
    assert out["zero_probs"] is None

    # sanity: removing log_intensity gives a log-softmax -> probs sum to ~1
    log_intensity = jnp.log(out["total_intensity"])[..., None]
    probs = jnp.exp(out["all_log_mark_intensities"] - log_intensity)
    assert jnp.allclose(probs.sum(-1), 1.0, atol=1e-3)
    assert bool(jnp.all(out["total_intensity"] > 0.0))

    print("KERNEL_OK")
</pallas_src>

<mosaic_0001>
module attributes {stable_mosaic.version = 11 : i64} {
  func.func @kernel(%arg0: i32, %arg1: memref<16x32xbf16, #tpu.memory_space<vmem>>, %arg2: memref<32x128xbf16, #tpu.memory_space<vmem>>, %arg3: memref<1x128xf32, #tpu.memory_space<vmem>>, %arg4: memref<128x128xbf16, #tpu.memory_space<vmem>>, %arg5: memref<1x128xf32, #tpu.memory_space<vmem>>, %arg6: memref<128x128xbf16, #tpu.memory_space<vmem>>, %arg7: memref<1x128xf32, #tpu.memory_space<vmem>>, %arg8: memref<16x128xf32, #tpu.memory_space<vmem>>) attributes {dimension_semantics = [#tpu.dimension_semantics<parallel>], iteration_bounds = array<i64: 1>, scalar_prefetch = 0 : i64, scratch_operands = 0 : i64, tpu.core_type = #tpu.core_type<tc>, window_params = [{transform_indices = @transform_0, window_bounds = array<i64: 16, 32>}, {pipeline_mode = #tpu.pipeline_mode<synchronous>, transform_indices = @transform_1, window_bounds = array<i64: 32, 128>}, {pipeline_mode = #tpu.pipeline_mode<synchronous>, transform_indices = @transform_2, window_bounds = array<i64: 1, 128>}, {pipeline_mode = #tpu.pipeline_mode<synchronous>, transform_indices = @transform_3, window_bounds = array<i64: 128, 128>}, {pipeline_mode = #tpu.pipeline_mode<synchronous>, transform_indices = @transform_4, window_bounds = array<i64: 1, 128>}, {pipeline_mode = #tpu.pipeline_mode<synchronous>, transform_indices = @transform_5, window_bounds = array<i64: 128, 128>}, {pipeline_mode = #tpu.pipeline_mode<synchronous>, transform_indices = @transform_6, window_bounds = array<i64: 1, 128>}, {transform_indices = @transform_7, window_bounds = array<i64: 16, 128>}]} {
    %c0 = arith.constant 0 : index
    %c0_0 = arith.constant 0 : index
    %0 = vector.load %arg1[%c0, %c0_0] : memref<16x32xbf16, #tpu.memory_space<vmem>>, vector<16x32xbf16>
    %c0_1 = arith.constant 0 : index
    %c0_2 = arith.constant 0 : index
    %1 = vector.load %arg2[%c0_1, %c0_2] : memref<32x128xbf16, #tpu.memory_space<vmem>>, vector<32x128xbf16>
    %cst = arith.constant dense<0.000000e+00> : vector<16x128xf32>
    %2 = tpu.matmul %0, %1, %cst {dimension_numbers = #tpu.dot_dimension_numbers<[1], [0], [0], [1], [0, 0, 1, 1], [], []>} : vector<16x32xbf16>, vector<32x128xbf16>, vector<16x128xf32> -> vector<16x128xf32>
    %c0_3 = arith.constant 0 : index
    %c0_4 = arith.constant 0 : index
    %3 = vector.load %arg3[%c0_3, %c0_4] : memref<1x128xf32, #tpu.memory_space<vmem>>, vector<1x128xf32>
    %4 = vector.broadcast %3 : vector<1x128xf32> to vector<16x128xf32>
    %5 = arith.addf %2, %4 : vector<16x128xf32>
    %cst_5 = arith.constant 0.000000e+00 : f32
    %6 = vector.broadcast %cst_5 : f32 to vector<16x128xf32>
    %7 = arith.maximumf %5, %6 : vector<16x128xf32>
    %8 = arith.truncf %7 : vector<16x128xf32> to vector<16x128xbf16>
    %c0_6 = arith.constant 0 : index
    %c0_7 = arith.constant 0 : index
    %9 = vector.load %arg4[%c0_6, %c0_7] : memref<128x128xbf16, #tpu.memory_space<vmem>>, vector<128x128xbf16>
    %cst_8 = arith.constant dense<0.000000e+00> : vector<16x128xf32>
    %10 = tpu.matmul %8, %9, %cst_8 {dimension_numbers = #tpu.dot_dimension_numbers<[1], [0], [0], [1], [0, 0, 1, 1], [], []>} : vector<16x128xbf16>, vector<128x128xbf16>, vector<16x128xf32> -> vector<16x128xf32>
    %c0_9 = arith.constant 0 : index
    %c0_10 = arith.constant 0 : index
    %11 = vector.load %arg5[%c0_9, %c0_10] : memref<1x128xf32, #tpu.memory_space<vmem>>, vector<1x128xf32>
    %12 = vector.broadcast %11 : vector<1x128xf32> to vector<16x128xf32>
    %13 = arith.addf %10, %12 : vector<16x128xf32>
    %cst_11 = arith.constant 0.000000e+00 : f32
    %14 = vector.broadcast %cst_11 : f32 to vector<16x128xf32>
    %15 = arith.maximumf %13, %14 : vector<16x128xf32>
    %16 = arith.truncf %15 : vector<16x128xf32> to vector<16x128xbf16>
    %c0_12 = arith.constant 0 : index
    %c0_13 = arith.constant 0 : index
    %17 = vector.load %arg6[%c0_12, %c0_13] : memref<128x128xbf16, #tpu.memory_space<vmem>>, vector<128x128xbf16>
    %cst_14 = arith.constant dense<0.000000e+00> : vector<16x128xf32>
    %18 = tpu.matmul %16, %17, %cst_14 {dimension_numbers = #tpu.dot_dimension_numbers<[1], [0], [0], [1], [0, 0, 1, 1], [], []>} : vector<16x128xbf16>, vector<128x128xbf16>, vector<16x128xf32> -> vector<16x128xf32>
    %c0_15 = arith.constant 0 : index
    %c0_16 = arith.constant 0 : index
    %19 = vector.load %arg7[%c0_15, %c0_16] : memref<1x128xf32, #tpu.memory_space<vmem>>, vector<1x128xf32>
    %20 = vector.broadcast %19 : vector<1x128xf32> to vector<16x128xf32>
    %21 = arith.addf %18, %20 : vector<16x128xf32>
    %22 = tpu.iota {dimensions = array<i32: 1>} : vector<16x128xi32>
    %c16_i32 = arith.constant 16 : i32
    %23 = vector.broadcast %c16_i32 : i32 to vector<16x128xi32>
    %24 = arith.cmpi slt, %22, %23 : vector<16x128xi32>
    %cst_17 = arith.constant 0xFF800000 : f32
    %25 = vector.broadcast %cst_17 : f32 to vector<16x128xf32>
    %26 = arith.select %24, %21, %25 : vector<16x128xi1>, vector<16x128xf32>
    %cst_18 = arith.constant dense<0xFF800000> : vector<16xf32>
    %27 = vector.multi_reduction <maximumf>, %26, %cst_18 [1] : vector<16x128xf32> to vector<16xf32>
    %28 = vector.shape_cast %27 : vector<16xf32> to vector<16x1xf32>
    %29 = vector.broadcast %28 : vector<16x1xf32> to vector<16x128xf32>
    %30 = arith.subf %26, %29 : vector<16x128xf32>
    %31 = math.exp %30 : vector<16x128xf32>
    %cst_19 = arith.constant dense<0.000000e+00> : vector<16xf32>
    %32 = vector.multi_reduction <add>, %31, %cst_19 [1] : vector<16x128xf32> to vector<16xf32>
    %33 = vector.shape_cast %32 : vector<16xf32> to vector<16x1xf32>
    %34 = math.log %33 : vector<16x1xf32>
    %35 = arith.addf %34, %28 : vector<16x1xf32>
    %c16_i32_20 = arith.constant 16 : i32
    %36 = vector.broadcast %c16_i32_20 : i32 to vector<16x128xi32>
    %37 = arith.cmpi eq, %22, %36 : vector<16x128xi32>
    %cst_21 = arith.constant 0.000000e+00 : f32
    %38 = vector.broadcast %cst_21 : f32 to vector<16x128xf32>
    %39 = arith.select %37, %21, %38 : vector<16x128xi1>, vector<16x128xf32>
    %cst_22 = arith.constant dense<0.000000e+00> : vector<16xf32>
    %40 = vector.multi_reduction <add>, %39, %cst_22 [1] : vector<16x128xf32> to vector<16xf32>
    %41 = vector.shape_cast %40 : vector<16xf32> to vector<16x1xf32>
    %42 = arith.subf %41, %35 : vector<16x1xf32>
    %43 = vector.broadcast %42 : vector<16x1xf32> to vector<16x128xf32>
    %44 = arith.addf %21, %43 : vector<16x128xf32>
    %c16_i32_23 = arith.constant 16 : i32
    %45 = vector.broadcast %c16_i32_23 : i32 to vector<16x128xi32>
    %46 = arith.cmpi eq, %22, %45 : vector<16x128xi32>
    %47 = math.exp %41 : vector<16x1xf32>
    %cst_24 = arith.constant 0.000000e+00 : f32
    %48 = vector.shape_cast %47 : vector<16x1xf32> to vector<16x1xf32>
    %49 = vector.broadcast %48 : vector<16x1xf32> to vector<16x128xf32>
    %50 = vector.broadcast %cst_24 : f32 to vector<16x128xf32>
    %51 = arith.select %46, %49, %50 : vector<16x128xi1>, vector<16x128xf32>
    %52 = arith.select %24, %44, %51 : vector<16x128xi1>, vector<16x128xf32>
    %c0_25 = arith.constant 0 : index
    %c0_26 = arith.constant 0 : index
    %53 = vector.load %arg8[%c0_25, %c0_26] : memref<16x128xf32, #tpu.memory_space<vmem>>, vector<16x128xf32>
    tpu.vector_store %arg8[%c0_25, %c0_26], %52 {strides = array<i32>} : memref<16x128xf32, #tpu.memory_space<vmem>>, vector<16x128xf32>,
    return
  }
  func.func @transform_0(%arg0: i32) -> (i32, i32) {
    %c0_i32 = arith.constant 0 : i32
    %c0_i32_0 = arith.constant 0 : i32
    return %arg0, %c0_i32 : i32, i32
  }
  func.func @transform_1(%arg0: i32) -> (i32, i32) {
    %c0_i32 = arith.constant 0 : i32
    %c0_i32_0 = arith.constant 0 : i32
    %c0_i32_1 = arith.constant 0 : i32
    return %c0_i32, %c0_i32_0 : i32, i32
  }
  func.func @transform_2(%arg0: i32) -> (i32, i32) {
    %c0_i32 = arith.constant 0 : i32
    %c0_i32_0 = arith.constant 0 : i32
    %c0_i32_1 = arith.constant 0 : i32
    return %c0_i32, %c0_i32_0 : i32, i32
  }
  func.func @transform_3(%arg0: i32) -> (i32, i32) {
    %c0_i32 = arith.constant 0 : i32
    %c0_i32_0 = arith.constant 0 : i32
    %c0_i32_1 = arith.constant 0 : i32
    return %c0_i32, %c0_i32_0 : i32, i32
  }
  func.func @transform_4(%arg0: i32) -> (i32, i32) {
    %c0_i32 = arith.constant 0 : i32
    %c0_i32_0 = arith.constant 0 : i32
    %c0_i32_1 = arith.constant 0 : i32
    return %c0_i32, %c0_i32_0 : i32, i32
  }
  func.func @transform_5(%arg0: i32) -> (i32, i32) {
    %c0_i32 = arith.constant 0 : i32
    %c0_i32_0 = arith.constant 0 : i32
    %c0_i32_1 = arith.constant 0 : i32
    return %c0_i32, %c0_i32_0 : i32, i32
  }
  func.func @transform_6(%arg0: i32) -> (i32, i32) {
    %c0_i32 = arith.constant 0 : i32
    %c0_i32_0 = arith.constant 0 : i32
    %c0_i32_1 = arith.constant 0 : i32
    return %c0_i32, %c0_i32_0 : i32, i32
  }
  func.func @transform_7(%arg0: i32) -> (i32, i32) {
    %c0_i32 = arith.constant 0 : i32
    %c0_i32_0 = arith.constant 0 : i32
    return %arg0, %c0_i32 : i32, i32
  }
}

</mosaic_0001>

<bundles_post_ra>
// kernel: squeeze.1
= control target key start
LH: loop header
LB: loop body
LE: loop exit
PB: predicated region body
PF: predicated region fallthrough
CT: control target
= control target key end

     0   :  { %s85_s0 = inlined_call_operand.vmem [shape: f32[16], index: 0, kind: input, shape index: {}]   ;;  %s86_s1 = inlined_call_operand.hbm [shape: f32[2,8], index: 1, kind: output, shape index: {}]  }
   0x1   :  { %v5_v0 = vld [vmem:[%s85_s0] sm:$0x1] }
   0x2   :  { %2 = vsyncpa [#allocation1], 0  ;;  %6 = vst [vmem:[#allocation3] sm:$0x1] %v5_v0  ;;  %vm8_vm0 = vcmask 64512   ;;  %s58_s0 = smov 120  }
   0x3   :  { %s59_s8 = smov [#allocation0]  }
   0x4   :  { %s26_s9 = sshll.u32 %s59_s8, 4  ;;  %s27_s9 = int_to_ptr.vmem [resolvable:$true] %s26_s9 }
   0x5   :  { %s34_s10 = scalar_lea.vmem %s27_s9, 32  ;;  %p39_p1 = scmp.lt.s32.totalorder %s27_s9, %s27_s9 }
   0x6   :  { %p35_p0 = scmp.ne.s32.totalorder %s27_s9, %s34_s10  ;;  %p40_p2 = scmp.lt.s32.totalorder %s34_s10, %s34_s10 }
   0x8   :  { %p41_p3 = por %p40_p2, %p39_p1 }
   0x9   :  { %v10_v1 = vld [vmem:[#allocation3] sm:$0x1]  }
   0xa   :  { %v7_v2 = vld [vmem:[#allocation3] sm:$0x1]   ;;  %11 = vrot.lane.b32.xlu0 %v10_v1, %s58_s0  ;;  %p42_p4 = pnand %p41_p3, %p35_p0 }
   0xb   :  { %9 = vst.msk [vmem:[#allocation2] sm:$0x1] %vm8_vm0, %v7_v2  }
  0x7c   :  { %v12_v3 = vpop.permute.xlu0 %11  }
  0x7d   :  { %15 = vst.msk [vmem:[#allocation2 + $0x1] sm:$0x1] %vm8_vm0, %v12_v3  }
  0x84   :  { %v19_v4 = vld [vmem:[#allocation2] sm:$0x3] }
  0x85   :  { %21 = vst [vmem:[#allocation0] sm:$0x3] %v19_v4 }
  0x86   :  { %45 = shalt.err (!%p42_p4)
}
  0x87   :  { %s46_s13 = scalar_lea.hbm %s86_s1, 32 }
  0x88   :  { %p47_p5 = scmp.ne.s32.totalorder %s86_s1, %s46_s13  ;;  %p50_p6 = scmp.lt.u32.totalorder %s46_s13, %s86_s1 }
  0x8a   :  { %p52_p7 = pnand %p50_p6, %p47_p5 }
  0x8c   :  { %55 = shalt.err (!%p52_p7)
}
  0x8d   :  { %29 = dma.vmem_to_hbm [thread:$0]  %s27_s9, 32, %s86_s1, [#allocation1]  }
  0x8e   :  { %56 = dma.done.wait [#allocation1], 32  }
  0x8f   :  { %57 = vsyncadd [#allocation1], 4294967264 }
  0x90   :  { %31 = vsyncpa [#allocation1], 1 }

// kernel: _lambda_.1
= control target key start
LH: loop header
LB: loop body
LE: loop exit
PB: predicated region body
PF: predicated region fallthrough
CT: control target
= control target key end

     0   :  { %12 = vsyncpa [#allocation3], 0  ;;  %s549_s24 = smov [#allocation2]   ;;  %s686_s0 = inlined_call_operand.vmem [shape: bf16[16,32], index: 0, kind: input, shape index: {}]   ;;  %s687_s1 = inlined_call_operand.vmem [shape: bf16[32,128], index: 1, kind: input, shape index: {}]   ;;  %s688_s2 = inlined_call_operand.vmem [shape: f32[1,128], index: 2, kind: input, shape index: {}]   ;;  %s689_s3 = inlined_call_operand.hbm [shape: bf16[128,128], index: 3, kind: input, shape index: {}]   ;;  %s690_s4 = inlined_call_operand.vmem [shape: f32[1,128], index: 4, kind: input, shape index: {}]   ;;  %s691_s5 = inlined_call_operand.vmem [shape: bf16[128,128], index: 5, kind: input, shape index: {}]   ;;  %s692_s6 = inlined_call_operand.vmem [shape: f32[1,128], index: 6, kind: input, shape index: {}]   ;;  %s693_s7 = inlined_call_operand.vmem [shape: f32[16,128], index: 7, kind: output, shape index: {}]  }
   0x1   :  { %s24_s25 = sshll.u32 %s549_s24, 4  ;;  %s525_s28 = scalar_lea.hbm %s689_s3, 1024  ;;  %s25_s25 = int_to_ptr.vmem [resolvable:$true] %s24_s25 }
   0x2   :  { %p526_p0 = scmp.ne.s32.totalorder %s689_s3, %s525_s28  ;;  %p529_p1 = scmp.lt.u32.totalorder %s525_s28, %s689_s3 }
   0x4   :  { %p531_p2 = pnand %p529_p1, %p526_p0 }
   0x6   :  { %534 = shalt.err (!%p531_p2)
}
   0x7   :  { %s535_s10 = scalar_lea.vmem %s25_s25, 1024  ;;  %p540_p4 = scmp.lt.s32.totalorder %s25_s25, %s25_s25 }
   0x8   :  { %p536_p3 = scmp.ne.s32.totalorder %s25_s25, %s535_s10  ;;  %p541_p5 = scmp.lt.s32.totalorder %s535_s10, %s535_s10 }
   0xa   :  { %p542_p6 = por %p541_p5, %p540_p4 }
   0xc   :  { %p543_p7 = pnand %p542_p6, %p536_p3 }
   0xe   :  { %546 = shalt.err (!%p543_p7)
}
   0xf   :  { %s550_s11 = smov 64   ;;  %s551_s12 = smov 4  }
  0x10   :  { %30 = dma.hbm_to_vmem [thread:$0]  %s689_s3, 1024, %s25_s25, [#allocation3], %s550_s11, %s550_s11, %s551_s12  }
  0x11   :  { %547 = dma.done.wait [#allocation3], 1024  }
  0x12   :  { %548 = vsyncadd [#allocation3], 4294966272  ;;  %v552_v0 = vmov 0.0   ;;  %vm553_vm0 = vmmov 0   ;;  %v494_v1 = vld [vmem:[%s687_s1] sm:$0xff]   ;;  %v495_v2 = vld [vmem:[%s687_s1 + $0x8] sm:$0xff]   ;;  %v346_v40 = vlaneseq }
  0x13   :  { %441 = vmatprep.subr.bf16.mxu0 %v552_v0  ;;  %445 = vmatprep.mubr.msk.bf16.mxu0 %vm553_vm0, %v552_v0  ;;  %v497_v3 = vld [vmem:[#allocation2] sm:$0xff]   ;;  %v498_v5 = vld [vmem:[#allocation2 + $0x8] sm:$0xff]   ;;  %vm71_vm1 = vcmask 261120   ;;  %v499_v6 = vld [vmem:[#allocation2 + $0x10] sm:$0xff]  }
  0x14   :  { %449 = vmatprep.subr.bf16.mxu1 %v552_v0  ;;  %465 = vmatprep.mubr.msk.bf16.mxu1 %vm553_vm0, %v552_v0  ;;  %v496_v4 = vld [vmem:[%s686_s0] sm:$0xff]   ;;  %v500_v7 = vld [vmem:[#allocation2 + $0x18] sm:$0xff]   ;;  %v502_v9 = vld [vmem:[#allocation2 + $0x28] sm:$0xff]   ;;  %v347_v41 = vand.u32 127, %v346_v40 }
  0x15   :  { %442 = vmatpush3.bf16.msra.mxu0 %v494_v1  ;;  %450 = vmatpush3.bf16.msra.mxu1 %v497_v3  ;;  %v501_v8 = vld [vmem:[#allocation2 + $0x20] sm:$0xff]   ;;  %v503_v10 = vld [vmem:[#allocation2 + $0x30] sm:$0xff]   ;;  %v504_v11 = vld [vmem:[#allocation2 + $0x38] sm:$0xff]  }
  0x16   :  { %443 = vmatprep.subr.bf16.mxu0 %v552_v0  ;;  %451 = vmatprep.subr.bf16.mxu1 %v552_v0  ;;  %v505_v12 = vld [vmem:[%s691_s5] sm:$0xff]   ;;  %v506_v13 = vld [vmem:[%s691_s5 + $0x8] sm:$0xff]   ;;  %v507_v14 = vld [vmem:[%s691_s5 + $0x10] sm:$0xff]   ;;  %vm348_vm2 = vcmp.lt.s32.totalorder %v347_v41, 16  ;;  %vm371_vm3 = vcmp.eq.s32.totalorder %v347_v41, 16 }
  0x17   :  { %v508_v15 = vld [vmem:[%s691_s5 + $0x18] sm:$0xff]   ;;  %v509_v16 = vld [vmem:[%s691_s5 + $0x20] sm:$0xff]   ;;  %v510_v17 = vld [vmem:[%s691_s5 + $0x28] sm:$0xff]  }
  0x18   :  { %v397_v18 = vld [vmem:[%s688_s2] ss:$0 sm:$0xff]  ;;  %v511_v28 = vld [vmem:[%s691_s5 + $0x30] sm:$0xff]   ;;  %v512_v29 = vld [vmem:[%s691_s5 + $0x38] sm:$0xff]  }
  0x19   :  { %444 = vmatpush3.bf16.msra.mxu0 %v495_v2  ;;  %452 = vmatpush3.bf16.msra.mxu1 %v498_v5  ;;  %v402_v30 = vld [vmem:[%s690_s4] ss:$0 sm:$0xff] }
  0x1a   :  { %469 = vmatprep.subr.bf16.mxu0 %v552_v0  ;;  %453 = vmatprep.subr.bf16.mxu1 %v552_v0  ;;  %v411_v42 = vld [vmem:[%s692_s6] ss:$0 sm:$0xff] }
  0x1c   :  { %446 = vmatmul.mubr.msk.bf16.vlgmr.msra.gmra.mrb[0].mxu0 %vm71_vm1, %v496_v4 }
  0x1d   :  { %485 = vmatprep.mubr.msk.bf16.mxu0 %vm553_vm0, %v552_v0  ;;  %454 = vmatpush3.bf16.msra.mxu1 %v499_v6 }
  0x1e   :  { %455 = vmatprep.subr.bf16.mxu1 %v552_v0  ;;  %470 = vmatpush3.bf16.msra.mxu0 %v505_v12 }
  0x1f   :  { %471 = vmatprep.subr.bf16.mxu0 %v552_v0 }
  0x21   :  { %456 = vmatpush3.bf16.msra.mxu1 %v500_v7 }
  0x22   :  { %457 = vmatprep.subr.bf16.mxu1 %v552_v0  ;;  %472 = vmatpush3.bf16.msra.mxu0 %v506_v13 }
  0x23   :  { %473 = vmatprep.subr.bf16.mxu0 %v552_v0 }
  0x25   :  { %458 = vmatpush3.bf16.msra.mxu1 %v501_v8 }
  0x26   :  { %459 = vmatprep.subr.bf16.mxu1 %v552_v0  ;;  %474 = vmatpush3.bf16.msra.mxu0 %v507_v14 }
  0x27   :  { %475 = vmatprep.subr.bf16.mxu0 %v552_v0 }
  0x29   :  { %460 = vmatpush3.bf16.msra.mxu1 %v502_v9 }
  0x2a   :  { %461 = vmatprep.subr.bf16.mxu1 %v552_v0  ;;  %476 = vmatpush3.bf16.msra.mxu0 %v508_v15 }
  0x2b   :  { %477 = vmatprep.subr.bf16.mxu0 %v552_v0 }
  0x2d   :  { %462 = vmatpush3.bf16.msra.mxu1 %v503_v10 }
  0x2e   :  { %463 = vmatprep.subr.bf16.mxu1 %v552_v0  ;;  %478 = vmatpush3.bf16.msra.mxu0 %v509_v16 }
  0x2f   :  { %479 = vmatprep.subr.bf16.mxu0 %v552_v0 }
  0x31   :  { %464 = vmatpush3.bf16.msra.mxu1 %v504_v11 }
  0x32   :  { %480 = vmatpush3.bf16.msra.mxu0 %v510_v17 }
  0x33   :  { %481 = vmatprep.subr.bf16.mxu0 %v552_v0 }
  0x36   :  { %482 = vmatpush3.bf16.msra.mxu0 %v511_v28 }
  0x37   :  { %483 = vmatprep.subr.bf16.mxu0 %v552_v0 }
  0x3a   :  { %484 = vmatpush3.bf16.msra.mxu0 %v512_v29 }
  0xef   :  { %v109_v19 = vpop.f32.mrb[0].mxu0 }
  0xf0   :  { %v110_v20 = vadd.f32 %v397_v18, %v109_v19  ;;  %v447_v21 = vpop.f32.mrb[1].mxu0 }
  0xf1   :  { %v112_v22 = vpop.f32.mrb[2].mxu0 }
  0xf2   :  { %v113_v23 = vadd.f32 %v397_v18, %v112_v22  ;;  %v448_v24 = vpop.f32.mrb[3].mxu0  ;;  %v116_v25 = vmax.f32 %v110_v20, 0.0 }
  0xf4   :  { %v117_v26 = vmax.f32 %v113_v23, 0.0 }
  0xf6   :  { %v118_v27 = vpack.c.bf16 %v117_v26, %v116_v25 }
  0xf8   :  { %466 = vmatmul.mubr.bf16.vlgmr.msra.gmra.mrb[0].mxu1 %v118_v27 }
 0x1cb   :  { %v224_v31 = vpop.f32.mrb[0].mxu1 }
 0x1cc   :  { %v225_v32 = vadd.f32 %v402_v30, %v224_v31  ;;  %v467_v33 = vpop.f32.mrb[1].mxu1 }
 0x1cd   :  { %v227_v34 = vpop.f32.mrb[2].mxu1 }
 0x1ce   :  { %v228_v35 = vadd.f32 %v402_v30, %v227_v34  ;;  %v468_v36 = vpop.f32.mrb[3].mxu1  ;;  %v231_v37 = vmax.f32 %v225_v32, 0.0 }
 0x1d0   :  { %v232_v38 = vmax.f32 %v228_v35, 0.0 }
 0x1d2   :  { %v233_v39 = vpack.c.bf16 %v232_v38, %v231_v37 }
 0x1d4   :  { %486 = vmatmul.mubr.bf16.vlgmr.msra.gmra.mrb[4].mxu0 %v233_v39 }
 0x2a7   :  { %v339_v43 = vpop.f32.mrb[4].mxu0 }
 0x2a8   :  { %v340_v44 = vadd.f32 %v411_v42, %v339_v43  ;;  %v487_v45 = vpop.f32.mrb[5].mxu0 }
 0x2a9   :  { %v342_v46 = vpop.f32.mrb[6].mxu0 }
 0x2aa   :  { %v343_v47 = vadd.f32 %v411_v42, %v342_v46  ;;  %v488_v48 = vpop.f32.mrb[7].mxu0  ;;  %v349_v49 = vsel %vm348_vm2, %v340_v44, -inf  ;;  %v372_v51 = vsel %vm371_vm3, %v340_v44, 0.0 }
 0x2ab   :  { %351 = vmax.xlane.f32.xlu0 %v349_v49 }
 0x2ac   :  { %v350_v50 = vsel %vm348_vm2, %v343_v47, -inf  ;;  %v373_v60 = vsel %vm371_vm3, %v343_v47, 0.0 }
 0x2af   :  { %353 = vmax.xlane.f32.xlu0 %v350_v50 }
 0x2b3   :  { %374 = vadd.xlane.f32.xlu0 %v372_v51 }
 0x338   :  { %v352_v52 = vpop.xlane.xlu0 %351 }
 0x339   :  { %v355_v53 = vsub.f32 %v349_v49, %v352_v52 }
 0x33b   :  { %v357_v54 = vmul.f32 1.442695, %v355_v53 }
 0x33c   :  { %v354_v55 = vpop.xlane.xlu0 %353 }
 0x33d   :  { %v356_v56 = vsub.f32 %v350_v50, %v354_v55  ;;  %513 = vpow2.f32 %v357_v54 }
 0x33f   :  { %v359_v57 = vmul.f32 1.442695, %v356_v56 }
 0x340   :  { %v375_v61 = vpop.xlane.xlu0 %374 }
 0x341   :  { %515 = vpow2.f32 %v359_v57  ;;  %v382_v63 = vmul.f32 1.442695, %v375_v61 }
 0x347   :  { %v514_v58 = vpop.eup %513 }
 0x348   :  { %361 = vadd.xlane.f32.xlu1 %v514_v58 }
 0x34b   :  { %v516_v59 = vpop.eup %515 }
 0x34c   :  { %363 = vadd.xlane.f32.xlu1 %v516_v59 }
 0x350   :  { %376 = vadd.xlane.f32.xlu1 %v373_v60 }
 0x3d5   :  { %v362_v62 = vpop.xlane.xlu1 %361 }
 0x3d6   :  { %517 = vlog2.f32 %v362_v62 }
 0x3d9   :  { %v364_v0 = vpop.xlane.xlu1 %363 }
 0x3da   :  { %519 = vlog2.f32 %v364_v0 }
 0x3db   :  { %521 = vpow2.f32 %v382_v63 }
 0x3dd   :  { %v377_v1 = vpop.xlane.xlu1 %376 }
 0x3de   :  { %v384_v2 = vmul.f32 1.442695, %v377_v1 }
 0x3e0   :  { %v518_v3 = vpop.eup %517  ;;  %523 = vpow2.f32 %v384_v2 }
 0x3e1   :  { %v366_v4 = vmul.f32 0.6931472, %v518_v3 }
 0x3e3   :  { %v369_v5 = vadd.f32 %v366_v4, %v352_v52 }
 0x3e4   :  { %v520_v6 = vpop.eup %519 }
 0x3e5   :  { %v522_v7 = vpop.eup %521  ;;  %v378_v8 = vsub.f32 %v375_v61, %v369_v5  ;;  %v368_v9 = vmul.f32 0.6931472, %v520_v6 }
 0x3e6   :  { %v386_v12 = vsel %vm371_vm3, %v522_v7, 0.0 }
 0x3e7   :  { %v380_v10 = vadd.f32 %v378_v8, %v340_v44  ;;  %v370_v11 = vadd.f32 %v368_v9, %v354_v55 }
 0x3e9   :  { %v388_v13 = vsel %vm348_vm2, %v380_v10, %v386_v12  ;;  %v379_v14 = vsub.f32 %v377_v1, %v370_v11 }
 0x3ea   :  { %v524_v15 = vpop.eup %523  ;;  %390 = vst [vmem:[%s693_s7] sm:$0xff] %v388_v13 }
 0x3eb   :  { %v381_v16 = vadd.f32 %v379_v14, %v343_v47  ;;  %v387_v17 = vsel %vm371_vm3, %v524_v15, 0.0 }
 0x3ed   :  { %v389_v18 = vsel %vm348_vm2, %v381_v16, %v387_v17 }
 0x3ee   :  { %391 = vst [vmem:[%s693_s7 + $0x8] sm:$0xff] %v389_v18 }
 0x3ef   :  { %396 = vsyncpa [#allocation3], 1 }

</bundles_post_ra>
